<compile_context>
chip_gen: v6e
topology: v6e:2x2x1
jax: 0.10.0
libtpu: 0.0.40
codegen_flags: <defaults>
</compile_context>

<pallas_src>
import jax
import jax.numpy as jnp
from jax.experimental import pallas as pl
from jax.experimental.pallas import tpu as pltpu

_LANES = 128
_STAT_ROWS = 8       # per-split partial stats kept as 8 sublane-parallel rows
_NUM_SPLITS = 2      # leading "parallel" grid axis (maps onto v7x's 2 TensorCores)


def _round_up(v, m):
    return ((v + m - 1) // m) * m


def _conv_stats_kernel(p_ref, w_ref, y_ref, sum_ref, ssq_ref):
    """Pass 1: (TM,K)x(K,CP) MXU matmul (f32 acc), bf16 store, partial channel stats."""
    i = pl.program_id(1)   # inner ("arbitrary") M-tile axis within this split

    y = jnp.dot(p_ref[...], w_ref[...], preferred_element_type=jnp.float32)
    y_ref[...] = y.astype(y_ref.dtype)          # lane-dense bf16 writeback

    # Stats output blocks are revisited (constant block index) across the inner
    # "arbitrary" axis and differ per split, so accumulation into the output ref
    # is race-free on megacore and only the final value lands in HBM.
    @pl.when(i == 0)
    def _():
        sum_ref[...] = jnp.zeros_like(sum_ref)
        ssq_ref[...] = jnp.zeros_like(ssq_ref)

    # Keep 8 sublane-parallel partial rows: cheap VPU adds (no full cross-sublane
    # reduce in the hot loop).  Stats stay f32 even though the stored y is bf16.
    tm, cp = y.shape
    y3 = y.reshape(tm // _STAT_ROWS, _STAT_ROWS, cp)
    sum_ref[...] += jnp.sum(y3, axis=0)
    ssq_ref[...] += jnp.sum(y3 * y3, axis=0)


def _bn_relu_kernel(y_ref, scale_ref, shift_ref, o_ref):
    """Pass 2: y*scale + shift, ReLU.  bf16 in/out (output aliased onto the input)."""
    y = y_ref[...].astype(jnp.float32)
    o_ref[...] = jnp.maximum(y * scale_ref[...] + shift_ref[...], 0.0).astype(o_ref.dtype)


def conv_block(x_nchw, weight, bias, gamma, beta, *, stride=1, padding=1, eps=1e-5):
    """ConvBlock forward.  x_nchw: (N, Cin, Hin, Win); weight: (Cout, Cin, KH, KW)."""
    del bias  # Conv bias cancels exactly under the following training-mode BN.

    N, Cin, Hin, Win = x_nchw.shape
    Cout, _, KH, KW = weight.shape
    H = (Hin + 2 * padding - KH) // stride + 1
    W = (Win + 2 * padding - KW) // stride + 1
    M = N * H * W
    K = KH * KW * Cin
    CP = _round_up(Cout, _LANES)                 # lane-dense output channels

    # ---- generation-aware tile / VMEM sizing ---------------------------------
    try:
        info = pltpu.get_tpu_info()
        vmem_cap = int(getattr(info, "vmem_capacity_bytes", 64 * 1024 * 1024))
    except Exception:                                           # pragma: no cover
        vmem_cap = 64 * 1024 * 1024
    # ~96 MiB on v5e/v6e (128 MiB physical), ~48 MiB on v7x (64 MiB per TC).
    vmem_limit = int(min((vmem_cap * 3) // 4, 100 * 1024 * 1024))

    def _fits(tm):
        # double-buffered bf16 patches-in + bf16 conv-out, double-buffered weights,
        # f32 stats blocks; keep ~2x headroom.
        need = 2 * (tm * K * 2 + tm * CP * 2) + 2 * (K * CP * 2) \
               + 4 * (_STAT_ROWS * CP * 4)
        return need <= vmem_limit // 2

    tm_target = 256
    for cand in (512, 1024):
        if _fits(cand):
            tm_target = cand

    half = -(-M // _NUM_SPLITS)                       # rows handled by each split
    TM = min(tm_target, _round_up(half, 16))          # 16: bf16 sublane packing
    tiles_per_split = -(-half // TM)
    M_pad = _NUM_SPLITS * tiles_per_split * TM
    total_tiles = M_pad // TM

    # ---- wrapper glue: NCHW->NHWC (bf16), spatial zero-pad, im2col -----------
    # bf16 cast happens BEFORE the KH*KW tap expansion, so the ~9x patches buffer
    # only ever exists in 2-byte form.  Zero-padded M rows / Cout columns
    # contribute exactly 0 to the stats (no bias in-kernel), so the reduction
    # divisor stays the true M.
    x = jnp.transpose(x_nchw, (0, 2, 3, 1)).astype(jnp.bfloat16)
    x = jnp.pad(x, ((0, 0), (padding, padding), (padding, padding), (0, 0)))
    taps = []
    for kh in range(KH):
        for kw in range(KW):
            taps.append(x[:, kh:kh + (H - 1) * stride + 1:stride,
                             kw:kw + (W - 1) * stride + 1:stride, :])
    patches = jnp.concatenate(taps, axis=-1).reshape(M, K)          # (M, KH*KW*Cin)
    patches = jnp.pad(patches, ((0, M_pad - M), (0, 0)))

    w2 = jnp.transpose(weight, (2, 3, 1, 0)).reshape(K, Cout)       # (kh,kw,cin)->cout
    w2 = jnp.pad(w2, ((0, 0), (0, CP - Cout))).astype(jnp.bfloat16)

    # ---- pass 1: conv tiles (bf16 out) + per-split partial sum / sum-sq ------
    conv_out, psum, pssq = pl.pallas_call(
        _conv_stats_kernel,
        out_shape=(jax.ShapeDtypeStruct((M_pad, CP), jnp.bfloat16),
                   jax.ShapeDtypeStruct((_NUM_SPLITS * _STAT_ROWS, CP), jnp.float32),
                   jax.ShapeDtypeStruct((_NUM_SPLITS * _STAT_ROWS, CP), jnp.float32)),
        grid_spec=pltpu.PrefetchScalarGridSpec(
            num_scalar_prefetch=0,
            grid=(_NUM_SPLITS, tiles_per_split),
            in_specs=[pl.BlockSpec((TM, K), lambda c, i: (c * tiles_per_split + i, 0)),
                      pl.BlockSpec((K, CP), lambda c, i: (0, 0))],
            out_specs=(pl.BlockSpec((TM, CP),
                                    lambda c, i: (c * tiles_per_split + i, 0)),
                       pl.BlockSpec((_STAT_ROWS, CP), lambda c, i: (c, 0)),
                       pl.BlockSpec((_STAT_ROWS, CP), lambda c, i: (c, 0)))),
        compiler_params=pltpu.CompilerParams(
            dimension_semantics=("parallel", "arbitrary"),
            vmem_limit_bytes=vmem_limit),
        cost_estimate=pl.CostEstimate(
            flops=2 * M_pad * K * CP,
            transcendentals=0,
            bytes_accessed=M_pad * K * 2 + K * CP * 2 + M_pad * CP * 2
                           + 2 * _NUM_SPLITS * _STAT_ROWS * CP * 4),
    )(patches, w2)

    # ---- tiny (CP,) BN finalize in plain JAX: precompute scale / shift -------
    # TODO(synk): E[y^2]-mean^2 in f32 can cancel if |mean| >> std; fine at these
    # scales, switch to shifted sums for pathological activation distributions.
    ch_sum = jnp.sum(psum, axis=0)
    ch_ssq = jnp.sum(pssq, axis=0)
    mean = ch_sum / M
    var = jnp.maximum(ch_ssq / M - mean * mean, 0.0)   # biased variance (training BN)
    g = jnp.pad(gamma.astype(jnp.float32), (0, CP - Cout))
    b = jnp.pad(beta.astype(jnp.float32), (0, CP - Cout))
    scale_1d = g * jax.lax.rsqrt(var + eps)
    shift_1d = b - mean * scale_1d
    scale = scale_1d.reshape(1, CP)
    shift = shift_1d.reshape(1, CP)

    # ---- pass 2: y*scale + shift, ReLU; output aliased onto conv_out ---------
    out = pl.pallas_call(
        _bn_relu_kernel,
        out_shape=jax.ShapeDtypeStruct((M_pad, CP), jnp.bfloat16),
        grid_spec=pltpu.PrefetchScalarGridSpec(
            num_scalar_prefetch=0,
            grid=(total_tiles,),
            in_specs=[pl.BlockSpec((TM, CP), lambda i: (i, 0)),
                      pl.BlockSpec((1, CP), lambda i: (0, 0)),
                      pl.BlockSpec((1, CP), lambda i: (0, 0))],
            out_specs=pl.BlockSpec((TM, CP), lambda i: (i, 0))),
        compiler_params=pltpu.CompilerParams(
            dimension_semantics=("parallel",),
            vmem_limit_bytes=vmem_limit),
        input_output_aliases={0: 0},
        cost_estimate=pl.CostEstimate(
            flops=3 * M_pad * CP,
            transcendentals=0,
            bytes_accessed=2 * M_pad * CP * 2 + 2 * 2 * CP * 4),
    )(conv_out, scale, shift)

    # TODO(synk): when chaining ConvBlocks, keep the native (M, Cout)/NHWC bf16
    # layout and skip this slice/transpose/upcast (extra full read+write in XLA).
    out = out[:M, :Cout].astype(jnp.float32).reshape(N, H, W, Cout)
    return jnp.transpose(out, (0, 3, 1, 2))                         # NHWC -> NCHW


def _reference(x, weight, bias, gamma, beta, *, stride, padding, eps):
    """Pure-JAX reference of the PyTorch forward (training-mode BN)."""
    y = jax.lax.conv_general_dilated(
        x, weight, (stride, stride), [(padding, padding)] * 2,
        dimension_numbers=("NCHW", "OIHW", "NCHW"))
    y = y + bias[None, :, None, None]
    mean = jnp.mean(y, axis=(0, 2, 3), keepdims=True)
    var = jnp.mean((y - mean) ** 2, axis=(0, 2, 3), keepdims=True)
    y = (y - mean) / jnp.sqrt(var + eps) * gamma[None, :, None, None] \
        + beta[None, :, None, None]
    return jnp.maximum(y, 0.0)


if __name__ == "__main__":
    # ConvBlock(in_channels=4, out_channels=8, kernel_size=3, stride=1, padding=1)
    N, Cin, Hin, Win = 2, 4, 16, 16
    Cout, KH, KW = 8, 3, 3
    stride, padding = 1, 1

    key = jax.random.PRNGKey(0)
    kx, kw, kb, kg, kbeta = jax.random.split(key, 5)
    x = jax.random.normal(kx, (N, Cin, Hin, Win), jnp.float32)
    weight = jax.random.normal(kw, (Cout, Cin, KH, KW), jnp.float32) * 0.1
    bias = jax.random.normal(kb, (Cout,), jnp.float32) * 0.1
    gamma = 1.0 + 0.1 * jax.random.normal(kg, (Cout,), jnp.float32)
    beta = 0.1 * jax.random.normal(kbeta, (Cout,), jnp.float32)

    out = conv_block(x, weight, bias, gamma, beta,
                     stride=stride, padding=padding, eps=1e-5)
    out = jax.block_until_ready(out)

    ref = _reference(x, weight, bias, gamma, beta,
                     stride=stride, padding=padding, eps=1e-5)
    assert out.shape == (N, Cout, Hin, Win)
    # Tolerance accounts for bf16 matmul operands, bf16 conv intermediate and
    # bf16 final store (f32 accumulation / f32 BN statistics throughout).
    assert jnp.allclose(out, ref, atol=5e-2, rtol=5e-2), \
        f"max abs err {jnp.max(jnp.abs(out - ref))}"

    print("KERNEL_OK")
</pallas_src>

<mosaic_0001>
module attributes {stable_mosaic.version = 11 : i64} {
  func.func @_conv_stats_kernel(%arg0: i32, %arg1: i32, %arg2: memref<256x36xbf16, #tpu.memory_space<vmem>>, %arg3: memref<36x128xbf16, #tpu.memory_space<vmem>>, %arg4: memref<256x128xbf16, #tpu.memory_space<vmem>>, %arg5: memref<8x128xf32, #tpu.memory_space<vmem>>, %arg6: memref<8x128xf32, #tpu.memory_space<vmem>>) attributes {dimension_semantics = [#tpu.dimension_semantics<parallel>, #tpu.dimension_semantics<arbitrary>], iteration_bounds = array<i64: 2, 1>, scalar_prefetch = 0 : i64, scratch_operands = 0 : i64, tpu.core_type = #tpu.core_type<tc>, window_params = [{transform_indices = @transform_0, window_bounds = array<i64: 256, 36>}, {pipeline_mode = #tpu.pipeline_mode<synchronous>, transform_indices = @transform_1, window_bounds = array<i64: 36, 128>}, {transform_indices = @transform_2, window_bounds = array<i64: 256, 128>}, {transform_indices = @transform_3, window_bounds = array<i64: 8, 128>}, {transform_indices = @transform_4, window_bounds = array<i64: 8, 128>}]} {
    %c0 = arith.constant 0 : index
    %c0_0 = arith.constant 0 : index
    %0 = vector.load %arg2[%c0, %c0_0] : memref<256x36xbf16, #tpu.memory_space<vmem>>, vector<256x36xbf16>
    %c0_1 = arith.constant 0 : index
    %c0_2 = arith.constant 0 : index
    %1 = vector.load %arg3[%c0_1, %c0_2] : memref<36x128xbf16, #tpu.memory_space<vmem>>, vector<36x128xbf16>
    %cst = arith.constant dense<0.000000e+00> : vector<256x128xf32>
    %2 = tpu.matmul %0, %1, %cst {dimension_numbers = #tpu.dot_dimension_numbers<[1], [0], [0], [1], [0, 0, 1, 1], [], []>} : vector<256x36xbf16>, vector<36x128xbf16>, vector<256x128xf32> -> vector<256x128xf32>
    %3 = arith.truncf %2 : vector<256x128xf32> to vector<256x128xbf16>
    %c0_3 = arith.constant 0 : index
    %c0_4 = arith.constant 0 : index
    %4 = vector.load %arg4[%c0_3, %c0_4] : memref<256x128xbf16, #tpu.memory_space<vmem>>, vector<256x128xbf16>
    tpu.vector_store %arg4[%c0_3, %c0_4], %3 {strides = array<i32>} : memref<256x128xbf16, #tpu.memory_space<vmem>>, vector<256x128xbf16>,
    %c0_i32 = arith.constant 0 : i32
    %5 = arith.cmpi eq, %arg1, %c0_i32 : i32
    %6 = arith.extui %5 : i1 to i32
    %c0_i32_5 = arith.constant 0 : i32
    %7 = arith.cmpi ne, %6, %c0_i32_5 : i32
    scf.if %7 {
      %cst_16 = arith.constant 0.000000e+00 : f32
      %18 = vector.broadcast %cst_16 : f32 to vector<8x128xf32>
      %c0_17 = arith.constant 0 : index
      %c0_18 = arith.constant 0 : index
      %19 = vector.load %arg5[%c0_17, %c0_18] : memref<8x128xf32, #tpu.memory_space<vmem>>, vector<8x128xf32>
      tpu.vector_store %arg5[%c0_17, %c0_18], %18 {strides = array<i32>} : memref<8x128xf32, #tpu.memory_space<vmem>>, vector<8x128xf32>,
      %cst_19 = arith.constant 0.000000e+00 : f32
      %20 = vector.broadcast %cst_19 : f32 to vector<8x128xf32>
      %c0_20 = arith.constant 0 : index
      %c0_21 = arith.constant 0 : index
      %21 = vector.load %arg6[%c0_20, %c0_21] : memref<8x128xf32, #tpu.memory_space<vmem>>, vector<8x128xf32>
      tpu.vector_store %arg6[%c0_20, %c0_21], %20 {strides = array<i32>} : memref<8x128xf32, #tpu.memory_space<vmem>>, vector<8x128xf32>,
    } else {
    }
    %8 = vector.shape_cast %2 : vector<256x128xf32> to vector<32x8x128xf32>
    %c0_6 = arith.constant 0 : index
    %c0_7 = arith.constant 0 : index
    %9 = vector.load %arg5[%c0_6, %c0_7] : memref<8x128xf32, #tpu.memory_space<vmem>>, vector<8x128xf32>
    %cst_8 = arith.constant dense<0.000000e+00> : vector<8x128xf32>
    %10 = vector.multi_reduction <add>, %8, %cst_8 [0] : vector<32x8x128xf32> to vector<8x128xf32>
    %11 = arith.addf %9, %10 : vector<8x128xf32>
    %c0_9 = arith.constant 0 : index
    %c0_10 = arith.constant 0 : index
    %12 = vector.load %arg5[%c0_9, %c0_10] : memref<8x128xf32, #tpu.memory_space<vmem>>, vector<8x128xf32>
    tpu.vector_store %arg5[%c0_9, %c0_10], %11 {strides = array<i32>} : memref<8x128xf32, #tpu.memory_space<vmem>>, vector<8x128xf32>,
    %c0_11 = arith.constant 0 : index
    %c0_12 = arith.constant 0 : index
    %13 = vector.load %arg6[%c0_11, %c0_12] : memref<8x128xf32, #tpu.memory_space<vmem>>, vector<8x128xf32>
    %14 = arith.mulf %8, %8 : vector<32x8x128xf32>
    %cst_13 = arith.constant dense<0.000000e+00> : vector<8x128xf32>
    %15 = vector.multi_reduction <add>, %14, %cst_13 [0] : vector<32x8x128xf32> to vector<8x128xf32>
    %16 = arith.addf %13, %15 : vector<8x128xf32>
    %c0_14 = arith.constant 0 : index
    %c0_15 = arith.constant 0 : index
    %17 = vector.load %arg6[%c0_14, %c0_15] : memref<8x128xf32, #tpu.memory_space<vmem>>, vector<8x128xf32>
    tpu.vector_store %arg6[%c0_14, %c0_15], %16 {strides = array<i32>} : memref<8x128xf32, #tpu.memory_space<vmem>>, vector<8x128xf32>,
    return
  }
  func.func @transform_0(%arg0: i32, %arg1: i32) -> (i32, i32) {
    %c1_i32 = arith.constant 1 : i32
    %0 = arith.muli %arg0, %c1_i32 : i32
    %1 = arith.addi %0, %arg1 : i32
    %c0_i32 = arith.constant 0 : i32
    %c0_i32_0 = arith.constant 0 : i32
    return %1, %c0_i32 : i32, i32
  }
  func.func @transform_1(%arg0: i32, %arg1: i32) -> (i32, i32) {
    %c0_i32 = arith.constant 0 : i32
    %c0_i32_0 = arith.constant 0 : i32
    %c0_i32_1 = arith.constant 0 : i32
    return %c0_i32, %c0_i32_0 : i32, i32
  }
  func.func @transform_2(%arg0: i32, %arg1: i32) -> (i32, i32) {
    %c1_i32 = arith.constant 1 : i32
    %0 = arith.muli %arg0, %c1_i32 : i32
    %1 = arith.addi %0, %arg1 : i32
    %c0_i32 = arith.constant 0 : i32
    %c0_i32_0 = arith.constant 0 : i32
    return %1, %c0_i32 : i32, i32
  }
  func.func @transform_3(%arg0: i32, %arg1: i32) -> (i32, i32) {
    %c0_i32 = arith.constant 0 : i32
    %c0_i32_0 = arith.constant 0 : i32
    return %arg0, %c0_i32 : i32, i32
  }
  func.func @transform_4(%arg0: i32, %arg1: i32) -> (i32, i32) {
    %c0_i32 = arith.constant 0 : i32
    %c0_i32_0 = arith.constant 0 : i32
    return %arg0, %c0_i32 : i32, i32
  }
}

</mosaic_0001>

<bundles_post_ra>
// kernel: tpu_custom_call.1
= control target key start
LH: loop header
LB: loop body
LE: loop exit
PB: predicated region body
PF: predicated region fallthrough
CT: control target
= control target key end

     0   :  { %10 = vsyncpa [#allocation3], 0  ;;  %s1914_s0 = inlined_call_operand.vmem [shape: bf16[512,36], index: 0, kind: input, shape index: {}]   ;;  %s1915_s1 = inlined_call_operand.vmem [shape: bf16[36,128], index: 1, kind: input, shape index: {}]   ;;  %s1916_s2 = inlined_call_operand.hbm [shape: bf16[512,128], index: 2, kind: output, shape index: {0}]   ;;  %s1917_s3 = inlined_call_operand.hbm [shape: f32[16,128], index: 3, kind: output, shape index: {1}]   ;;  %s1918_s4 = inlined_call_operand.hbm [shape: f32[16,128], index: 4, kind: output, shape index: {2}]  }
   0x1   :  { %12 = vsyncpa [#allocation3 + $0x1], 0 }
   0x2   :  { %13 = vsyncpa [#allocation5], 0 }
   0x3   :  { %15 = vsyncpa [#allocation5 + $0x1], 0  ;;  %s1565_s15 = smov 0   ;;  %s1567_s16 = smov 0  }
   0x4   :  { %s1569_s17 = smov 0   ;;  %s1571_s18 = smov 0  }
   0x5   :  { %s1573_s19 = smov 0   ;;  %s1575_s20 = smov 0  }
   0x6 LB: > { %s1035_s21 = sadd.s32 4294967295, %s1533_s20   ;;  %s1036_s22 = sadd.s32 4294967294, %s1533_s20   ;;  %s1533_s20 = sphi %s1575_s20, %s21_s20   ;;  %s1529_s19 = sphi %s1573_s19, %s1925_s19   ;;  %s1525_s18 = sphi %s1571_s18, %s1924_s18   ;;  %s1521_s17 = sphi %s1569_s17, %s1923_s17   ;;  %s1517_s16 = sphi %s1567_s16, %s1922_s16   ;;  %s1513_s15 = sphi %s1565_s15, %s1921_s15  }
   0x7   : > { %s33_s23 = sadd.s32 1, %s1529_s19  ;;  %s91_s24 = sadd.s32 1, %s1521_s17 }
   0x8   : > { %p35_p0 = scmp.ge.s32.totalorder %s33_s23, 2  ;;  %p101_p1 = scmp.ne.s32.totalorder %s1521_s17, %s1517_s16 }
   0x9   : > { %p102_p2 = scmp.eq.s32.totalorder %s1035_s21, 1  ;;  %p107_p3 = scmp.ne.s32.totalorder %s1517_s16, %s1513_s15 }
   0xa   : > { %s1927_s23 = smov (%p35_p0, %s33_s23), 0  ;;  %p108_p5 = scmp.eq.s32.totalorder %s1036_s22, 1 }
   0xb   : > { %p1607_p4 = por %p102_p2, %p101_p1  ;;  %s88_s26 = ssub.s32 %s1529_s19, %s1927_s23 }
   0xc   : > { %p1039_p6 = scmp.ge.s32.totalorder %s1533_s20, 1  ;;  %p89_p7 = scmp.eq.s32.totalorder %s88_s26, 0 }
   0xd   : > { %p1616_p8 = por %p108_p5, %p107_p3  ;;  %p192_p9 = scmp.lt.s32.totalorder %s1533_s20, 3 }
   0xe   : > { %s1622_s28 = scalar_select %p89_p7, %s1521_s17, %s91_s24  }
   0xf   : > { %p193_p10 = pnand %p1039_p6, %p192_p9 }
  0x10   : > { %s1043_s7 = sshll.u32 (!%p193_p10), %s1525_s18, 5  ;;  %s1672_s14 = sand.u32 (!%p193_p10), 1, %s1517_s16  }
  0x11   : > { %196 = sbr.rel (%p193_p10) target bundleno = 340 (0x154), region = 28  ;;  %p231_p11 = scmp.lt.s32.totalorder (!%p193_p10), %s1043_s7, 63 }
  0x12   : > { %s1040_s24 = sshll.u32 (!%p193_p10), %s1672_s14, 7  ;;  %s1153_s29 = sshll.u32 (!%p193_p10), %s1525_s18, 11 }
  0x13   : > { %s1677_s26 = scalar_lea.vmem (!%p193_p10), [#allocation2], %s1040_s24  ;;  %s853_s8 = scalar_lea.sflag (!%p193_p10), [#allocation3], %s1672_s14 }
  0x14   : > { %s877_s30 = sshll.u32 (!%p193_p10), %s1677_s26, 4  ;;  %s1744_s30 = int_to_ptr.vmem [resolvable:$true] %s877_s30 }
  0x15   : > { %s1401_s9 = scalar_lea.vmem (!%p193_p10), %s1744_s30, 2048 }
  0x16   : > { %v1382_v0 = vld [vmem:[%s1915_s1 + $0x10] ss:$0 sps:$4 sm:$0x33]   ;;  %vm421_vm0 = vcmask 1041408   ;;  %v1383_v1 = vld [vmem:[%s1915_s1 + $0x8] sm:$0xff]   ;;  %v1384_v3 = vld [vmem:[%s1915_s1] sm:$0xff]   ;;  %p1402_p12 = scmp.ne.s32.totalorder %s1744_s30, %s1401_s9 }
  0x17   : > { %1312 = vmatprep.subr.msk.bf16.mxu0 %vm421_vm0, %v1382_v0  ;;  %v423_v2 = vsel %vm421_vm0, %v1382_v0, 0  ;;  %1313 = vmatprep.subr.msk.bf16.mxu1 %vm421_vm0, %v1382_v0  ;;  %s1929_s7 = smov (!%p231_p11, %s1043_s7), 63  ;;  %vm372_vm1 = vcmask 293888  }
  0x18   : > { %1269 = vmatpush3.bf16.msra.mxu0 %v423_v2  ;;  %1309 = vmatpush3.bf16.msra.mxu1 %v423_v2  ;;  %s1044_s10 = sshll.u32 %s1929_s7, 2  ;;  %s1742_s7 = scalar_lea.hbm %s1916_s2, %s1153_s29 }
  0x19   : > { %1270 = vmatprep.subr.bf16.mxu0 %v1383_v1  ;;  %1307 = vmatprep.subr.bf16.mxu1 %v1383_v1  ;;  %s1637_s13 = scalar_lea.vmem %s1914_s0, %s1044_s10  ;;  %p1403_p13 = pnand %p1402_p12, %p1607_p4 }
  0x1a   : > { %v1385_v4 = vld [vmem:[%s1637_s13] sm:$0xff]   ;;  %v1386_v5 = vld [vmem:[%s1637_s13 + $0x8] sm:$0xff]   ;;  %v1387_v6 = vld [vmem:[%s1637_s13 + $0x10] sm:$0xff]   ;;  %s1535_s10 = smov [#allocation2]  }
  0x1b   : > { %1274 = vmatprep.mubr.msk.bf16.mxu0 %vm372_vm1, %v1385_v4  ;;  %v1388_v7 = vld [vmem:[%s1637_s13 + $0x18] sm:$0xff]   ;;  %v1389_v8 = vld [vmem:[%s1637_s13 + $0x20] sm:$0xff]   ;;  %v1394_v10 = vld [vmem:[%s1637_s13 + $0x48] sm:$0xff]   ;;  %p1404_p0 = pneg %p1403_p13  ;;  %s1405_s11 = sshll.u32 %s1535_s10, 4  ;;  %s1406_s11 = int_to_ptr.vmem [resolvable:$false] %s1405_s11 }
  0x1c   : > { %1271 = vmatpush3.bf16.msra.mxu0 %v1383_v1  ;;  %1310 = vmatpush3.bf16.msra.mxu1 %v1383_v1  ;;  %v1393_v9 = vld [vmem:[%s1637_s13 + $0x40] sm:$0xff]   ;;  %v1395_v11 = vld [vmem:[%s1637_s13 + $0x50] sm:$0xff]   ;;  %v1396_v12 = vld [vmem:[%s1637_s13 + $0x58] sm:$0xff]   ;;  %s1407_s12 = scalar_lea.vmem %s1406_s11, 4096  ;;  %p1408_p1 = scmp.lt.s32.totalorder %s1744_s30, %s1406_s11 }
  0x1d   : > { %1272 = vmatprep.subr.bf16.mxu0 %v1384_v3  ;;  %1308 = vmatprep.subr.bf16.mxu1 %v1384_v3  ;;  %v1397_v13 = vld [vmem:[%s1637_s13 + $0x60] sm:$0xff]   ;;  %v1390_v14 = vld [vmem:[%s1637_s13 + $0x28] sm:$0xff]   ;;  %v1391_v15 = vld [vmem:[%s1637_s13 + $0x30] sm:$0xff]   ;;  %p1409_p2 = scmp.lt.s32.totalorder %s1407_s12, %s1401_s9 }
  0x1e   : > { %1290 = vmatprep.mubr.msk.bf16.mxu1 %vm372_vm1, %v1393_v9  ;;  %v1398_v16 = vld [vmem:[%s1637_s13 + $0x68] sm:$0xff]   ;;  %v1399_v17 = vld [vmem:[%s1637_s13 + $0x70] sm:$0xff]   ;;  %v1392_v18 = vld [vmem:[%s1637_s13 + $0x38] sm:$0xff]  }
  0x1f   : > { %v1400_v19 = vld [vmem:[%s1637_s13 + $0x78] sm:$0xff]   ;;  %p1410_p3 = por %p1409_p2, %p1408_p1 }
  0x20   : > { %1273 = vmatpush3.bf16.msra.mxu0 %v1384_v3  ;;  %1311 = vmatpush3.bf16.msra.mxu1 %v1384_v3 }
  0x21   : > { %p1411_p5 = pnand %p1410_p3, %p1404_p0 }
  0x23   : > { %1275 = vmatmul.mubr.msk.bf16.vlgmr.msra.gmra.mxu0 %vm372_vm1, %v1386_v5  ;;  %1291 = vmatmul.mubr.msk.bf16.vlgmr.msra.gmra.mxu1 %vm372_vm1, %v1394_v10 }
  0x24   : > { %1278 = vmatprep.mubr.msk.bf16.mxu0 %vm372_vm1, %v1387_v6  ;;  %1294 = vmatprep.mubr.msk.bf16.mxu1 %vm372_vm1, %v1395_v11 }
  0x2b   : > { %1279 = vmatmul.mubr.msk.bf16.gmra.mxu0 %vm372_vm1, %v1388_v7  ;;  %1295 = vmatmul.mubr.msk.bf16.gmra.mxu1 %vm372_vm1, %v1396_v12 }
  0x2c   : > { %1282 = vmatprep.mubr.msk.bf16.mxu0 %vm372_vm1, %v1389_v8  ;;  %1298 = vmatprep.mubr.msk.bf16.mxu1 %vm372_vm1, %v1397_v13 }
  0x33   : > { %1283 = vmatmul.mubr.msk.bf16.gmra.mxu0 %vm372_vm1, %v1390_v14  ;;  %1299 = vmatmul.mubr.msk.bf16.gmra.mxu1 %vm372_vm1, %v1398_v16 }
  0x34   : > { %1286 = vmatprep.mubr.msk.bf16.mxu0 %vm372_vm1, %v1391_v15  ;;  %1302 = vmatprep.mubr.msk.bf16.mxu1 %vm372_vm1, %v1399_v17 }
  0x3b   : > { %1287 = vmatmul.mubr.msk.bf16.gmra.mxu0 %vm372_vm1, %v1392_v18  ;;  %1303 = vmatmul.mubr.msk.bf16.gmra.mxu1 %vm372_vm1, %v1400_v19 }
  0xe3   : > { %v1276_v20 = vpop.f32.mrf.mxu0  ;;  %v1675_v25 = vpop.f32.mrf.mxu1 }
  0xe4   : > { %v789_v32 = vmul.f32 %v1276_v20, %v1276_v20 }
  0xe5   : > { %v459_v21 = vpop.f32.mrf.mxu0  ;;  %v1680_v31 = vpop.f32.mrf.mxu1 }
  0xe6   : > { %v787_v26 = vmul.f32 %v459_v21, %v459_v21 }
  0xe7   : > { %v1277_v22 = vpop.f32.mrf.mxu0  ;;  %v1683_v36 = vpop.f32.mrf.mxu1 }
  0xe8   : > { %v1162_v23 = vpack.c.bf16 %v1277_v22, %v1276_v20  ;;  %v790_v37 = vmul.f32 %v1277_v22, %v1277_v22  ;;  %v1202_v40 = vpack.c.bf16 %v1683_v36, %v1675_v25 }
  0xe9   : > { %v462_v24 = vpop.f32.mrf.mxu0  ;;  %v1687_v42 = vpop.f32.mrf.mxu1 }
  0xea   : > { %1234 = vst [vmem:[%s1677_s26 + $0x8] sm:$0xff] %v1162_v23   ;;  %v1157_v27 = vpack.c.bf16 %v462_v24, %v459_v21  ;;  %v753_v28 = vadd.f32 %v462_v24, %v459_v21  ;;  %v788_v29 = vmul.f32 %v462_v24, %v462_v24  ;;  %1242 = vst [vmem:[%s1677_s26 + $0x48] sm:$0xff] %v1202_v40  }
  0xeb   : > { %v1280_v30 = vpop.f32.mrf.mxu0  ;;  %v1197_v48 = vpack.c.bf16 %v1687_v42, %v1680_v31  ;;  %v1692_v49 = vpop.f32.mrf.mxu1 }
  0xec   : > { %1158 = vst [vmem:[%s1677_s26] sm:$0xff] %v1157_v27   ;;  %v754_v33 = vadd.f32 %v1276_v20, %v753_v28  ;;  %v819_v34 = vadd.f32 %v788_v29, %v787_v26  ;;  %v793_v56 = vmul.f32 %v1280_v30, %v1280_v30 }
  0xed   : > { %v475_v35 = vpop.f32.mrf.mxu0  ;;  %1241 = vst [vmem:[%s1677_s26 + $0x40] sm:$0xff] %v1197_v48   ;;  %v1696_v55 = vpop.f32.mrf.mxu1 }
  0xee   : > { %v820_v38 = vadd.f32 %v819_v34, %v789_v32  ;;  %v755_v39 = vadd.f32 %v1277_v22, %v754_v33  ;;  %v791_v44 = vmul.f32 %v475_v35, %v475_v35 }
  0xef   : > { %v1281_v41 = vpop.f32.mrf.mxu0  ;;  %v1699_v60 = vpop.f32.mrf.mxu1 }
  0xf0   : > { %v756_v43 = vadd.f32 %v755_v39, %v475_v35  ;;  %v821_v45 = vadd.f32 %v820_v38, %v790_v37  ;;  %v1172_v46 = vpack.c.bf16 %v1281_v41, %v1280_v30  ;;  %v794_v61 = vmul.f32 %v1281_v41, %v1281_v41 }
  0xf1   : > { %v478_v47 = vpop.f32.mrf.mxu0  ;;  %v1212_v0 = vpack.c.bf16 %v1699_v60, %v1692_v49  ;;  %v1703_v2 = vpop.f32.mrf.mxu1 }
  0xf2   : > { %v822_v50 = vadd.f32 %v821_v45, %v791_v44  ;;  %1236 = vst [vmem:[%s1677_s26 + $0x18] sm:$0xff] %v1172_v46   ;;  %v1167_v51 = vpack.c.bf16 %v478_v47, %v475_v35  ;;  %v757_v52 = vadd.f32 %v756_v43, %v478_v47  ;;  %v792_v53 = vmul.f32 %v478_v47, %v478_v47 }
  0xf3   : > { %v1284_v54 = vpop.f32.mrf.mxu0  ;;  %1244 = vst [vmem:[%s1677_s26 + $0x58] sm:$0xff] %v1212_v0   ;;  %v1207_v8 = vpack.c.bf16 %v1703_v2, %v1696_v55  ;;  %v1708_v9 = vpop.f32.mrf.mxu1 }
  0xf4   : > { %1235 = vst [vmem:[%s1677_s26 + $0x10] sm:$0xff] %v1167_v51   ;;  %v758_v57 = vadd.f32 %v1280_v30, %v757_v52  ;;  %v823_v58 = vadd.f32 %v822_v50, %v792_v53  ;;  %v797_v16 = vmul.f32 %v1284_v54, %v1284_v54  ;;  %v803_v53 = vmul.f32 %v1680_v31, %v1680_v31 }
  0xf5   : > { %v491_v59 = vpop.f32.mrf.mxu0  ;;  %1243 = vst [vmem:[%s1677_s26 + $0x50] sm:$0xff] %v1207_v8   ;;  %v1712_v15 = vpop.f32.mrf.mxu1 }
  0xf6   : > { %v824_v62 = vadd.f32 %v823_v58, %v793_v56  ;;  %v759_v63 = vadd.f32 %v1281_v41, %v758_v57  ;;  %v795_v4 = vmul.f32 %v491_v59, %v491_v59 }
  0xf7   : > { %v1285_v1 = vpop.f32.mrf.mxu0  ;;  %v1715_v20 = vpop.f32.mrf.mxu1 }
  0xf8   : > { %v760_v3 = vadd.f32 %v759_v63, %v491_v59  ;;  %v825_v5 = vadd.f32 %v824_v62, %v794_v61  ;;  %v1182_v6 = vpack.c.bf16 %v1285_v1, %v1284_v54  ;;  %v798_v21 = vmul.f32 %v1285_v1, %v1285_v1 }
  0xf9   : > { %v494_v7 = vpop.f32.mrf.mxu0  ;;  %v1222_v24 = vpack.c.bf16 %v1715_v20, %v1708_v9  ;;  %v1719_v27 = vpop.f32.mrf.mxu1 }
  0xfa   : > { %v826_v10 = vadd.f32 %v825_v5, %v795_v4  ;;  %1238 = vst [vmem:[%s1677_s26 + $0x28] sm:$0xff] %v1182_v6   ;;  %v1177_v11 = vpack.c.bf16 %v494_v7, %v491_v59  ;;  %v761_v12 = vadd.f32 %v760_v3, %v494_v7  ;;  %v796_v13 = vmul.f32 %v494_v7, %v494_v7 }
  0xfb   : > { %v1288_v14 = vpop.f32.mrf.mxu0  ;;  %1246 = vst [vmem:[%s1677_s26 + $0x68] sm:$0xff] %v1222_v24   ;;  %v1217_v34 = vpack.c.bf16 %v1719_v27, %v1712_v15  ;;  %v1724_v35 = vpop.f32.mrf.mxu1  ;;  %v804_v59 = vmul.f32 %v1687_v42, %v1687_v42 }
  0xfc   : > { %1237 = vst [vmem:[%s1677_s26 + $0x20] sm:$0xff] %v1177_v11   ;;  %v762_v17 = vadd.f32 %v1284_v54, %v761_v12  ;;  %v827_v18 = vadd.f32 %v826_v10, %v796_v13  ;;  %v801_v43 = vmul.f32 %v1288_v14, %v1288_v14 }
  0xfd   : > { %v507_v19 = vpop.f32.mrf.mxu0  ;;  %1245 = vst [vmem:[%s1677_s26 + $0x60] sm:$0xff] %v1217_v34   ;;  %v1728_v41 = vpop.f32.mrf.mxu1 }
  0xfe   : > { %v828_v22 = vadd.f32 %v827_v18, %v797_v16  ;;  %v763_v23 = vadd.f32 %v1285_v1, %v762_v17  ;;  %v799_v29 = vmul.f32 %v507_v19, %v507_v19 }
  0xff   : > { %v1289_v26 = vpop.f32.mrf.mxu0  ;;  %v1733_v46 = vpop.f32.mrf.mxu1 }
 0x100   : > { %v764_v28 = vadd.f32 %v763_v23, %v507_v19  ;;  %v829_v30 = vadd.f32 %v828_v22, %v798_v21  ;;  %v1192_v32 = vpack.c.bf16 %v1289_v26, %v1288_v14  ;;  %v802_v47 = vmul.f32 %v1289_v26, %v1289_v26 }
 0x101   : > { %v510_v33 = vpop.f32.mrf.mxu0  ;;  %v1232_v51 = vpack.c.bf16 %v1733_v46, %v1724_v35  ;;  %v1737_v52 = vpop.f32.mrf.mxu1 }
 0x102   : > { %v830_v37 = vadd.f32 %v829_v30, %v799_v29  ;;  %1240 = vst [vmem:[%s1677_s26 + $0x38] sm:$0xff] %v1192_v32   ;;  %v1187_v38 = vpack.c.bf16 %v510_v33, %v507_v19  ;;  %v765_v39 = vadd.f32 %v764_v28, %v510_v33  ;;  %v800_v40 = vmul.f32 %v510_v33, %v510_v33 }
 0x103   : > { %1248 = vst [vmem:[%s1677_s26 + $0x78] sm:$0xff] %v1232_v51   ;;  %v1227_v57 = vpack.c.bf16 %v1737_v52, %v1728_v41 }
 0x104   : > { %1239 = vst [vmem:[%s1677_s26 + $0x30] sm:$0xff] %v1187_v38   ;;  %v766_v44 = vadd.f32 %v1288_v14, %v765_v39  ;;  %v831_v45 = vadd.f32 %v830_v37, %v800_v40 }
 0x105   : > { %1247 = vst [vmem:[%s1677_s26 + $0x70] sm:$0xff] %v1227_v57  }
 0x106   : > { %v767_v48 = vadd.f32 %v1289_v26, %v766_v44  ;;  %v832_v50 = vadd.f32 %v831_v45, %v801_v43 }
 0x108   : > { %v833_v54 = vadd.f32 %v832_v50, %v802_v47  ;;  %v768_v56 = vadd.f32 %v767_v48, %v1680_v31 }
 0x10a   : > { %v769_v58 = vadd.f32 %v768_v56, %v1687_v42  ;;  %v834_v61 = vadd.f32 %v833_v54, %v803_v53 }
 0x10b   : > { %1414 = shalt.err (!%p1411_p5)
}
 0x10c   : > { %s1415_s13 = scalar_lea.hbm %s1742_s7, 2048  ;;  %s1419_s29 = scalar_lea.hbm %s1916_s2, 4096 }
 0x10d   : > { %p1416_p6 = scmp.ne.s32.totalorder %s1742_s7, %s1415_s13  ;;  %p1420_p10 = scmp.lt.s32.totalorder %s1742_s7, %s1916_s2 }
 0x10e   : > { %p1421_p11 = scmp.lt.s32.totalorder %s1419_s29, %s1415_s13 }
 0x10f   : > { %p1417_p7 = pnand %p1416_p6, %p1607_p4 }
 0x110   : > { %p1422_p12 = por %p1421_p11, %p1420_p10 }
 0x111   : > { %p1418_p9 = pneg %p1417_p7 }
 0x113   : > { %p1423_p13 = pnand %p1422_p12, %p1418_p9 }
 0x115   : > { %1426 = shalt.err (!%p1423_p13)
}
 0x116   : > { %s1536_s9 = smov 64   ;;  %s1537_s10 = smov 4   ;;  %v805_v31 = vmul.f32 %v1675_v25, %v1675_v25  ;;  %v770_v42 = vadd.f32 %v1675_v25, %v769_v58  ;;  %v835_v62 = vadd.f32 %v834_v61, %v804_v59  ;;  %v806_v63 = vmul.f32 %v1683_v36, %v1683_v36 }
 0x117   : > { %1314 = dma.vmem_to_hbm [thread:$0]  (%p1607_p4), %s1744_s30, 2048, %s1742_s7, %s853_s8, %s1536_s9, %s1536_s9, %s1537_s10   ;;  %v807_v4 = vmul.f32 %v1696_v55, %v1696_v55  ;;  %v808_v8 = vmul.f32 %v1703_v2, %v1703_v2  ;;  %v809_v25 = vmul.f32 %v1692_v49, %v1692_v49  ;;  %v811_v14 = vmul.f32 %v1712_v15, %v1712_v15 }
 0x118   : > { %v836_v0 = vadd.f32 %v835_v62, %v805_v31  ;;  %v771_v1 = vadd.f32 %v1683_v36, %v770_v42  ;;  %v810_v36 = vmul.f32 %v1699_v60, %v1699_v60  ;;  %v813_v18 = vmul.f32 %v1708_v9, %v1708_v9  ;;  %s1041_s30 = sshll.u32 %s1672_s14, 3  ;;  %s1821_s14 = sand.u32 1, %s1035_s21  }
 0x119   : > { %v814_v21 = vmul.f32 %v1715_v20, %v1715_v20  ;;  %v815_v24 = vmul.f32 %v1728_v41, %v1728_v41  ;;  %v817_v29 = vmul.f32 %v1724_v35, %v1724_v35  ;;  %s1117_s7 = sshll.u32 %s1525_s18, 7  ;;  %s221_s8 = scalar_lea.vmem [#allocation4], %s1041_s30 }
 0x11a   : > { %v772_v3 = vadd.f32 %v771_v1, %v1696_v55  ;;  %v837_v5 = vadd.f32 %v836_v0, %v806_v63  ;;  %s893_s11 = sshll.u32 %s221_s8, 4  ;;  %s1827_s12 = scalar_lea.vmem [#allocation6], %s1041_s30  ;;  %s1835_s11 = int_to_ptr.vmem [resolvable:$true] %s893_s11 }
 0x11b   : > { %s906_s13 = sshll.u32 %s1827_s12, 4  ;;  %s1833_s21 = scalar_lea.hbm %s1917_s3, %s1117_s7  ;;  %s1842_s13 = int_to_ptr.vmem [resolvable:$true] %s906_s13 }
 0x11c   : > { %v838_v6 = vadd.f32 %v837_v5, %v807_v4  ;;  %v773_v7 = vadd.f32 %v772_v3, %v1703_v2  ;;  %s1840_s5 = scalar_lea.hbm %s1918_s4, %s1117_s7  ;;  %s858_s6 = scalar_lea.sflag [#allocation5], %s1821_s14 }
 0x11d   : > { %s1427_s9 = scalar_lea.vmem %s1835_s11, 128  ;;  %s1538_s10 = smov [#allocation4]  }
 0x11e   : > { %v774_v10 = vadd.f32 %v1692_v49, %v773_v7  ;;  %v839_v11 = vadd.f32 %v838_v6, %v808_v8  ;;  %v812_v49 = vmul.f32 %v1719_v27, %v1719_v27  ;;  %p1428_p0 = scmp.ne.s32.totalorder %s1835_s11, %s1427_s9  ;;  %s1431_s30 = sshll.u32 %s1538_s10, 4  ;;  %s1432_s30 = int_to_ptr.vmem [resolvable:$false] %s1431_s30 }
 0x11f   : > { %s1433_s24 = scalar_lea.vmem %s1432_s30, 256  ;;  %p1434_p3 = scmp.lt.s32.totalorder %s1835_s11, %s1432_s30 }
 0x120   : > { %v840_v12 = vadd.f32 %v839_v11, %v809_v25  ;;  %v775_v55 = vadd.f32 %v1699_v60, %v774_v10  ;;  %p1429_p1 = pnand %p1428_p0, %p1607_p4  ;;  %p1435_p5 = scmp.lt.s32.totalorder %s1433_s24, %s1427_s9 }
 0x122   : > { %v776_v13 = vadd.f32 %v775_v55, %v1712_v15  ;;  %v841_v16 = vadd.f32 %v840_v12, %v810_v36  ;;  %p1430_p2 = pneg %p1429_p1  ;;  %p1436_p6 = por %p1435_p5, %p1434_p3 }
 0x124   : > { %v842_v2 = vadd.f32 %v841_v16, %v811_v14  ;;  %v777_v17 = vadd.f32 %v776_v13, %v1719_v27  ;;  %p1437_p7 = pnand %p1436_p6, %p1430_p2 }
 0x126   : > { %v778_v19 = vadd.f32 %v1708_v9, %v777_v17  ;;  %v843_v60 = vadd.f32 %v842_v2, %v812_v49  ;;  %v816_v9 = vmul.f32 %v1737_v52, %v1737_v52 }
 0x128   : > { %v844_v22 = vadd.f32 %v843_v60, %v813_v18  ;;  %v779_v15 = vadd.f32 %v1715_v20, %v778_v19  ;;  %v818_v20 = vmul.f32 %v1733_v46, %v1733_v46 }
 0x12a   : > { %v780_v23 = vadd.f32 %v779_v15, %v1728_v41  ;;  %v845_v26 = vadd.f32 %v844_v22, %v814_v21 }
 0x12c   : > { %v846_v27 = vadd.f32 %v845_v26, %v815_v24  ;;  %v781_v28 = vadd.f32 %v780_v23, %v1737_v52 }
 0x12e   : > { %v782_v30 = vadd.f32 %v1724_v35, %v781_v28  ;;  %v847_v32 = vadd.f32 %v846_v27, %v816_v9 }
 0x130   : > { %v783_v33 = vadd.f32 %v1733_v46, %v782_v30  ;;  %v848_v34 = vadd.f32 %v847_v32, %v817_v29 }
 0x132   : > { %v849_v35 = vadd.f32 %v848_v34, %v818_v20  ;;  %785 = vst [vmem:[%s221_s8] sm:$0xff] %v783_v33 }
 0x133   : > { %1440 = shalt.err (!%p1437_p7)
}
 0x134   : > { %s1441_s7 = scalar_lea.hbm %s1833_s21, 128  ;;  %s1445_s18 = scalar_lea.hbm %s1917_s3, 256 }
 0x135   : > { %p1442_p9 = scmp.ne.s32.totalorder %s1833_s21, %s1441_s7  ;;  %p1446_p12 = scmp.lt.s32.totalorder %s1833_s21, %s1917_s3 }
 0x136   : > { %p1447_p13 = scmp.lt.s32.totalorder %s1445_s18, %s1441_s7 }
 0x137   : > { %p1443_p10 = pnand %p1442_p9, %p1607_p4 }
 0x138   : > { %p1448_p0 = por %p1447_p13, %p1446_p12 }
 0x139   : > { %p1444_p11 = pneg %p1443_p10 }
 0x13b   : > { %p1449_p1 = pnand %p1448_p0, %p1444_p11 }
 0x13d   : > { %1452 = shalt.err (!%p1449_p1)
}
 0x13e   : > { %1315 = dma.vmem_to_hbm [thread:$0]  (%p1607_p4), %s1835_s11, 128, %s1833_s21, %s858_s6   ;;  %851 = vst [vmem:[%s1827_s12] sm:$0xff] %v849_v35 }
 0x13f   : > { %s1453_s9 = scalar_lea.vmem %s1842_s13, 128  ;;  %s1539_s30 = smov [#allocation6]  }
 0x140   : > { %p1454_p2 = scmp.ne.s32.totalorder %s1842_s13, %s1453_s9  ;;  %s1457_s24 = sshll.u32 %s1539_s30, 4  ;;  %s1458_s24 = int_to_ptr.vmem [resolvable:$false] %s1457_s24 }
 0x141   : > { %s1459_s7 = scalar_lea.vmem %s1458_s24, 256  ;;  %p1460_p6 = scmp.lt.s32.totalorder %s1842_s13, %s1458_s24 }
 0x142   : > { %p1455_p3 = pnand %p1454_p2, %p1607_p4  ;;  %p1461_p7 = scmp.lt.s32.totalorder %s1459_s7, %s1453_s9 }
 0x144   : > { %p1456_p5 = pneg %p1455_p3  ;;  %p1462_p9 = por %p1461_p7, %p1460_p6 }
 0x146   : > { %p1463_p10 = pnand %p1462_p9, %p1456_p5 }
 0x148   : > { %1466 = shalt.err (!%p1463_p10)
}
 0x149   : > { %s1467_s11 = scalar_lea.hbm %s1840_s5, 128  ;;  %s1471_s8 = scalar_lea.hbm %s1918_s4, 256 }
 0x14a   : > { %p1468_p11 = scmp.ne.s32.totalorder %s1840_s5, %s1467_s11  ;;  %p1472_p0 = scmp.lt.s32.totalorder %s1840_s5, %s1918_s4 }
 0x14b   : > { %p1473_p1 = scmp.lt.s32.totalorder %s1471_s8, %s1467_s11 }
 0x14c   : > { %p1469_p12 = pnand %p1468_p11, %p1607_p4 }
 0x14d   : > { %p1474_p2 = por %p1473_p1, %p1472_p0 }
 0x14e   : > { %p1470_p13 = pneg %p1469_p12 }
 0x150   : > { %p1475_p3 = pnand %p1474_p2, %p1470_p13 }
 0x152   : > { %1478 = shalt.err (!%p1475_p3)
}
 0x153   : > { %1316 = dma.vmem_to_hbm [thread:$0]  (%p1607_p4), %s1842_s13, 128, %s1840_s5, %s858_s6  }
 0x154 PF: > { %p1330_p5 = scmp.ge.s32.totalorder %s1533_s20, 2  ;;  %s918_s29 = sand.u32 1, %s1513_s15  }
 0x155   : > { %s919_s10 = scalar_lea.sflag [#allocation3], %s918_s29 }
 0x156   : > { %p1321_p6 = pnand %p1330_p5, %p1616_p8 }
 0x158   : > { %p1322_p7 = pneg %p1321_p6 }
 0x15a   : > { %1504 = dma.done.wait (%p1322_p7), %s919_s10, 2048  }
 0x15b   : > { %1506 = vsyncadd (%p1322_p7), %s919_s10, 4294965248  ;;  %s927_s25 = sand.u32 1, %s1036_s22  }
 0x15c   : > { %s928_s9 = scalar_lea.sflag [#allocation5], %s927_s25 }
 0x15d   : > { %1508 = dma.done.wait (%p1322_p7), %s928_s9, 256  }
 0x15e   : > { %1510 = vsyncadd (%p1322_p7), %s928_s9, 4294967040  ;;  %s21_s20 = sadd.s32 1, %s1533_s20   ;;  %s1921_s15 = smov %s1517_s16 }
 0x15f   : > { %p18_p4 = scmp.ge.s32.totalorder %s21_s20, 4   ;;  %s1922_s16 = smov %s1521_s17 }
 0x160   : > { %s1923_s17 = smov %s1622_s28  ;;  %s1924_s18 = smov %s1529_s19 }
 0x161   : > { %s1925_s19 = smov %s1927_s23  ;;  %20 = sbr.rel (!%p18_p4) target bundleno = 6 (0x6), region = 99 }
 0x166   :  { %942 = vsyncpa [#allocation3], 1 }
 0x167   :  { %944 = vsyncpa [#allocation3 + $0x1], 1 }
 0x168   :  { %945 = vsyncpa [#allocation5], 1 }
 0x169   :  { %947 = vsyncpa [#allocation5 + $0x1], 1 }

</bundles_post_ra>
